<compile_context>
chip_gen: v7x
topology: tpu7x:2x2x1
jax: 0.10.0
libtpu: 0.0.40
codegen_flags: <defaults>
</compile_context>

<pallas_src>
import functools

import jax
import jax.numpy as jnp
from jax.experimental import pallas as pl
from jax.experimental.pallas import tpu as pltpu

# Loss type enum values (mirror BidirectionalDiscriminatorLossType)
VANILLA_LOG_MEAN = 1
WASSERSTEIN = 2
VANILLA_MEAN_LOG = 3


def _round_up(x, m):
    return ((x + m - 1) // m) * m


def _log_sigmoid(x):
    # numerically stable log(sigmoid(x)) = min(x, 0) - log(1 + exp(-|x|))
    return jnp.minimum(x, 0.0) - jnp.log(1.0 + jnp.exp(-jnp.abs(x)))


def _bf16_eltwise_supported():
    """bf16 EUP/VPU exists on v6e/v7x; keep f32 elementwise on v5e and older."""
    try:
        kind = jax.devices()[0].device_kind.lower()
    except Exception:
        return False
    if "tpu" not in kind:
        return False
    for old in ("v2", "v3", "v4", "v5"):
        if old in kind:
            return False
    return True


def _bigan_disc_loss_kernel(loss_type, true_b, pad_b, z_dim, hid_dim, bf16_eltwise,
                            x_flat_ref, z_fake_ref, we_ref, wg_ref,
                            w1z_ref, w1x_ref, bg_ref, bias_ref,
                            loss_ref,
                            z_real_acc, hx_acc):
    """One D-block step of: encoder, generator, stacked disc, masked loss reduce."""
    f32 = jnp.float32
    bf16 = jnp.bfloat16

    k = pl.program_id(0)
    nk = pl.num_programs(0)

    @pl.when(k == 0)
    def _():
        z_real_acc[...] = jnp.zeros_like(z_real_acc)
        hx_acc[...] = jnp.zeros_like(hx_acc)

    x_real_blk = x_flat_ref[...]          # [Bp, tD]  bf16 (streamed D block)
    z_fake_bf = z_fake_ref[...]           # [Bp, Z]   bf16 (resident)

    # encoder partial: z_real += x_real_blk @ We_blk   (bf16 MXU, f32 accumulate)
    z_real_acc[...] += jnp.dot(x_real_blk, we_ref[...], preferred_element_type=f32)

    # generator for this D block: x_fake_blk = tanh(z_fake @ Wg_blk + bg_blk)
    pre = (jnp.dot(z_fake_bf, wg_ref[...], preferred_element_type=f32)
           + bg_ref[...].astype(f32))                           # [Bp, tD] f32
    if bf16_eltwise:
        x_fake_blk = jnp.tanh(pre.astype(bf16))                 # bf16 EUP (v6e/v7x)
    else:
        x_fake_blk = jnp.tanh(pre).astype(bf16)                 # f32 EUP (v5e)

    # Stack fake (rows [0,Bp)) and real (rows [Bp,2Bp)) so the x-part of the
    # discriminator layer-1 runs ONCE per D block, entirely in bf16.
    x_cat = jnp.concatenate([x_fake_blk, x_real_blk], axis=0)   # [2Bp, tD] bf16
    hx_acc[...] += jnp.dot(x_cat, w1x_ref[...], preferred_element_type=f32)

    @pl.when(k == nk - 1)
    def _():
        # Packed small constants: row0=be, row1=b1, row2[0]=b2, row3=w2 (f32).
        be = bias_ref[0:1, 0:z_dim]         # [1, Z]
        b1 = bias_ref[1:2, 0:hid_dim]       # [1, HID]
        b2 = bias_ref[2:3, 0:1]             # [1, 1]
        w2_row = bias_ref[3:4, 0:hid_dim]   # [1, HID]

        z_real_bf = (z_real_acc[...] + be).astype(bf16)                      # [Bp, Z]
        z_cat = jnp.concatenate([z_fake_bf, z_real_bf], axis=0)             # [2Bp, Z] bf16

        h = (jnp.dot(z_cat, w1z_ref[...], preferred_element_type=f32)
             + hx_acc[...] + b1)                                             # [2Bp, HID]
        h = jnp.maximum(h, 0.0)

        # W2 is [HID,1]: N=1 MXU matmul replaced by VPU broadcast-mul + XLU reduce.
        logit = jnp.sum(h * w2_row, axis=-1, keepdims=True) + b2             # [2Bp, 1]

        logit_fake = logit[0:pad_b]          # [Bp, 1]
        logit_real = logit[pad_b:2 * pad_b]  # [Bp, 1]

        # Mask host-side sublane padding; divide by the TRUE batch size.
        row = jax.lax.broadcasted_iota(jnp.int32, (pad_b, 1), 0)
        valid = row < true_b
        inv_b = 1.0 / true_b

        def masked_mean(v):
            return jnp.sum(jnp.where(valid, v, 0.0)) * inv_b

        if loss_type == VANILLA_LOG_MEAN:
            # -0.5*mean(log(sigmoid(real))) - 0.5*mean(log(1 - sigmoid(fake)))
            # from logits with stable log-sigmoid (log(1-s(x)) = ls(-x)).
            loss = (-0.5 * masked_mean(_log_sigmoid(logit_real))
                    - 0.5 * masked_mean(_log_sigmoid(-logit_fake)))
        elif loss_type == VANILLA_MEAN_LOG:
            # 1 - sigmoid(x) == sigmoid(-x) (same value, no cancellation).
            loss = (-0.5 * jnp.log(masked_mean(jax.nn.sigmoid(logit_real)))
                    - 0.5 * jnp.log(masked_mean(jax.nn.sigmoid(-logit_fake))))
        elif loss_type == WASSERSTEIN:
            # Reference discriminator output is sigmoid-squashed; keep that.
            loss = -(masked_mean(jax.nn.sigmoid(logit_real))
                     - masked_mean(jax.nn.sigmoid(logit_fake)))
        else:
            raise NotImplementedError(loss_type)

        loss_ref[0, 0] = loss


def bidirectional_discriminator_loss(batch, z_fake, params, loss_type, d_block=None):
    """Flatten NCHW batch, prep bf16/packed inputs, call the D-tiled fused kernel."""
    We, be, Wg, bg, W1z, W1x, b1, W2, b2 = params

    bf16 = jnp.bfloat16
    f32 = jnp.float32

    B = batch.shape[0]
    x_flat = batch.reshape(B, -1)          # torch .view(B, -1)
    D = x_flat.shape[1]
    Z = We.shape[1]
    HID = W1z.shape[1]

    # Pad batch rows to a multiple of 8 sublanes; mean is masked in-kernel.
    Bp = max(8, _round_up(B, 8))

    # D-reduction tile. Default 4096 keeps double-buffered streamed tiles well
    # under 64 MiB VMEM (v7x); v6e/v5e (128 MiB physical) tolerate larger.
    if d_block is None:
        d_block = 4096
    d_block = max(128, _round_up(d_block, 128))
    Dp = _round_up(D, 128)
    d_block = min(d_block, Dp)
    Dp = _round_up(Dp, d_block)
    n_d_blocks = Dp // d_block

    # bf16 MXU operands, zero-padded along D (zero pads contribute nothing).
    x_flat_p = jnp.zeros((Bp, Dp), bf16).at[:B, :D].set(x_flat.astype(bf16))
    z_fake_p = jnp.zeros((Bp, Z), bf16).at[:B, :].set(z_fake.astype(bf16))
    We_p = jnp.zeros((Dp, Z), bf16).at[:D, :].set(We.astype(bf16))
    Wg_p = jnp.zeros((Z, Dp), bf16).at[:, :D].set(Wg.astype(bf16))
    W1x_p = jnp.zeros((Dp, HID), bf16).at[:D, :].set(W1x.astype(bf16))
    bg_p = jnp.zeros((1, Dp), bf16).at[:, :D].set(bg.reshape(1, -1).astype(bf16))
    W1z_b = W1z.astype(bf16)

    # Pack the tiny constants (be, b1, b2, w2) into a single VMEM tile.
    max_zh = max(Z, HID)
    bias_buf = jnp.zeros((4, max_zh), f32)
    bias_buf = bias_buf.at[0, :Z].set(be.reshape(-1).astype(f32))
    bias_buf = bias_buf.at[1, :HID].set(b1.reshape(-1).astype(f32))
    bias_buf = bias_buf.at[2, 0].set(b2.astype(f32).reshape(()))
    bias_buf = bias_buf.at[3, :HID].set(W2.reshape(-1).astype(f32))

    bf16_eltwise = _bf16_eltwise_supported()

    kernel = functools.partial(_bigan_disc_loss_kernel,
                               loss_type, B, Bp, Z, HID, bf16_eltwise)

    # Advisory cost estimate for XLA's scheduler.
    flops = int(2 * Bp * Dp * Z            # encoder
                + 2 * Bp * Z * Dp          # generator
                + 2 * (2 * Bp) * Dp * HID  # disc layer-1 x part (stacked)
                + 2 * (2 * Bp) * Z * HID   # disc layer-1 z part (stacked)
                + 2 * (2 * Bp) * HID)      # w2 reduce
    transcendentals = int(Bp * Dp + 4 * Bp)
    bytes_accessed = int(2 * (x_flat_p.size + z_fake_p.size + We_p.size + Wg_p.size
                              + W1z_b.size + W1x_p.size + bg_p.size)
                         + 4 * bias_buf.size + 4)

    in_specs = [
        pl.BlockSpec((Bp, d_block), lambda k: (0, k)),    # x_flat   (streamed)
        pl.BlockSpec((Bp, Z), lambda k: (0, 0)),          # z_fake   (resident)
        pl.BlockSpec((d_block, Z), lambda k: (k, 0)),     # We       (streamed)
        pl.BlockSpec((Z, d_block), lambda k: (0, k)),     # Wg       (streamed)
        pl.BlockSpec((Z, HID), lambda k: (0, 0)),         # W1z      (resident)
        pl.BlockSpec((d_block, HID), lambda k: (k, 0)),   # W1x      (streamed)
        pl.BlockSpec((1, d_block), lambda k: (0, k)),     # bg       (streamed)
        pl.BlockSpec((4, max_zh), lambda k: (0, 0)),      # packed be/b1/b2/w2
    ]

    loss = pl.pallas_call(
        kernel,
        out_shape=jax.ShapeDtypeStruct((1, 1), f32),
        grid=(n_d_blocks,),
        in_specs=in_specs,
        out_specs=pl.BlockSpec((1, 1), lambda k: (0, 0),
                               memory_space=pltpu.MemorySpace.SMEM),
        scratch_shapes=[
            pltpu.VMEM((Bp, Z), f32),        # z_real accumulator
            pltpu.VMEM((2 * Bp, HID), f32),  # stacked x-part of disc layer-1
        ],
        compiler_params=pltpu.CompilerParams(
            dimension_semantics=("arbitrary",),
            vmem_limit_bytes=64 * 1024 * 1024),
        cost_estimate=pl.CostEstimate(flops=flops,
                                      transcendentals=transcendentals,
                                      bytes_accessed=bytes_accessed),
    )(x_flat_p, z_fake_p, We_p, Wg_p, W1z_b, W1x_p, bg_p, bias_buf)

    return {"loss": loss[0, 0]}


if __name__ == "__main__":
    # Small deterministic setup
    B, C, H, W = 2, 4, 16, 16
    Z, HID = 32, 64
    D = C * H * W

    key = jax.random.PRNGKey(0)
    keys = jax.random.split(key, 8)

    batch = jax.random.normal(keys[0], (B, C, H, W), jnp.float32)
    # bigan.sample_latent(batchsize)
    z_fake = jax.random.normal(keys[1], (B, Z), jnp.float32)

    # Deterministic synthetic BiGAN parameters
    We = 0.05 * jax.random.normal(keys[2], (D, Z), jnp.float32)     # encoder
    be = jnp.zeros((1, Z), jnp.float32)
    Wg = 0.05 * jax.random.normal(keys[3], (Z, D), jnp.float32)     # generator
    bg = jnp.zeros((1, D), jnp.float32)
    W1z = 0.05 * jax.random.normal(keys[4], (Z, HID), jnp.float32)  # disc layer1 (z part)
    W1x = 0.05 * jax.random.normal(keys[5], (D, HID), jnp.float32)  # disc layer1 (x part)
    b1 = jnp.zeros((1, HID), jnp.float32)
    W2 = 0.05 * jax.random.normal(keys[6], (HID, 1), jnp.float32)   # disc layer2
    b2 = jnp.zeros((1, 1), jnp.float32)

    params = (We, be, Wg, bg, W1z, W1x, b1, W2, b2)

    results = {}
    for lt in (VANILLA_LOG_MEAN, WASSERSTEIN, VANILLA_MEAN_LOG):
        # d_block=256 exercises the multi-step D grid (4 steps) at demo shapes;
        # production shapes use the default 4096 tile.
        out = bidirectional_discriminator_loss(batch, z_fake, params, lt,
                                               d_block=256)
        jax.block_until_ready(out["loss"])
        results[lt] = float(out["loss"])

    print("KERNEL_OK")
</pallas_src>

<mosaic_0001>
module attributes {stable_mosaic.version = 11 : i64} {
  func.func @_bigan_disc_loss_kernel(%arg0: i32, %arg1: memref<8x256xbf16, #tpu.memory_space<vmem>>, %arg2: memref<8x32xbf16, #tpu.memory_space<vmem>>, %arg3: memref<256x32xbf16, #tpu.memory_space<vmem>>, %arg4: memref<32x256xbf16, #tpu.memory_space<vmem>>, %arg5: memref<32x64xbf16, #tpu.memory_space<vmem>>, %arg6: memref<256x64xbf16, #tpu.memory_space<vmem>>, %arg7: memref<1x256xbf16, #tpu.memory_space<vmem>>, %arg8: memref<4x64xf32, #tpu.memory_space<vmem>>, %arg9: memref<1x1xf32, #tpu.memory_space<smem>>, %arg10: memref<8x32xf32, #tpu.memory_space<vmem>>, %arg11: memref<16x64xf32, #tpu.memory_space<vmem>>) attributes {dimension_semantics = [#tpu.dimension_semantics<arbitrary>], iteration_bounds = array<i64: 4>, scalar_prefetch = 0 : i64, scratch_operands = 2 : i64, tpu.core_type = #tpu.core_type<tc>, window_params = [{transform_indices = @transform_0, window_bounds = array<i64: 8, 256>}, {pipeline_mode = #tpu.pipeline_mode<synchronous>, transform_indices = @transform_1, window_bounds = array<i64: 8, 32>}, {transform_indices = @transform_2, window_bounds = array<i64: 256, 32>}, {transform_indices = @transform_3, window_bounds = array<i64: 32, 256>}, {pipeline_mode = #tpu.pipeline_mode<synchronous>, transform_indices = @transform_4, window_bounds = array<i64: 32, 64>}, {transform_indices = @transform_5, window_bounds = array<i64: 256, 64>}, {transform_indices = @transform_6, window_bounds = array<i64: 1, 256>}, {pipeline_mode = #tpu.pipeline_mode<synchronous>, transform_indices = @transform_7, window_bounds = array<i64: 4, 64>}, {transform_indices = @transform_8, window_bounds = array<i64: 1, 1>}]} {
    %c0_i32 = arith.constant 0 : i32
    %0 = arith.cmpi eq, %arg0, %c0_i32 : i32
    %1 = arith.extui %0 : i1 to i32
    %c0_i32_0 = arith.constant 0 : i32
    %2 = arith.cmpi ne, %1, %c0_i32_0 : i32
    scf.if %2 {
      %cst_23 = arith.constant 0.000000e+00 : f32
      %27 = vector.broadcast %cst_23 : f32 to vector<8x32xf32>
      %c0_24 = arith.constant 0 : index
      %c0_25 = arith.constant 0 : index
      %28 = vector.load %arg10[%c0_24, %c0_25] : memref<8x32xf32, #tpu.memory_space<vmem>>, vector<8x32xf32>
      tpu.vector_store %arg10[%c0_24, %c0_25], %27 {strides = array<i32>} : memref<8x32xf32, #tpu.memory_space<vmem>>, vector<8x32xf32>,
      %cst_26 = arith.constant 0.000000e+00 : f32
      %29 = vector.broadcast %cst_26 : f32 to vector<16x64xf32>
      %c0_27 = arith.constant 0 : index
      %c0_28 = arith.constant 0 : index
      %30 = vector.load %arg11[%c0_27, %c0_28] : memref<16x64xf32, #tpu.memory_space<vmem>>, vector<16x64xf32>
      tpu.vector_store %arg11[%c0_27, %c0_28], %29 {strides = array<i32>} : memref<16x64xf32, #tpu.memory_space<vmem>>, vector<16x64xf32>,
    } else {
    }
    %c0 = arith.constant 0 : index
    %c0_1 = arith.constant 0 : index
    %3 = vector.load %arg1[%c0, %c0_1] : memref<8x256xbf16, #tpu.memory_space<vmem>>, vector<8x256xbf16>
    %c0_2 = arith.constant 0 : index
    %c0_3 = arith.constant 0 : index
    %4 = vector.load %arg2[%c0_2, %c0_3] : memref<8x32xbf16, #tpu.memory_space<vmem>>, vector<8x32xbf16>
    %c0_4 = arith.constant 0 : index
    %c0_5 = arith.constant 0 : index
    %5 = vector.load %arg10[%c0_4, %c0_5] : memref<8x32xf32, #tpu.memory_space<vmem>>, vector<8x32xf32>
    %c0_6 = arith.constant 0 : index
    %c0_7 = arith.constant 0 : index
    %6 = vector.load %arg3[%c0_6, %c0_7] : memref<256x32xbf16, #tpu.memory_space<vmem>>, vector<256x32xbf16>
    %cst = arith.constant dense<0.000000e+00> : vector<8x32xf32>
    %7 = tpu.matmul %3, %6, %cst {dimension_numbers = #tpu.dot_dimension_numbers<[1], [0], [0], [1], [0, 0, 1, 1], [], []>} : vector<8x256xbf16>, vector<256x32xbf16>, vector<8x32xf32> -> vector<8x32xf32>
    %8 = arith.addf %5, %7 : vector<8x32xf32>
    %c0_8 = arith.constant 0 : index
    %c0_9 = arith.constant 0 : index
    %9 = vector.load %arg10[%c0_8, %c0_9] : memref<8x32xf32, #tpu.memory_space<vmem>>, vector<8x32xf32>
    tpu.vector_store %arg10[%c0_8, %c0_9], %8 {strides = array<i32>} : memref<8x32xf32, #tpu.memory_space<vmem>>, vector<8x32xf32>,
    %c0_10 = arith.constant 0 : index
    %c0_11 = arith.constant 0 : index
    %10 = vector.load %arg4[%c0_10, %c0_11] : memref<32x256xbf16, #tpu.memory_space<vmem>>, vector<32x256xbf16>
    %cst_12 = arith.constant dense<0.000000e+00> : vector<8x256xf32>
    %11 = tpu.matmul %4, %10, %cst_12 {dimension_numbers = #tpu.dot_dimension_numbers<[1], [0], [0], [1], [0, 0, 1, 1], [], []>} : vector<8x32xbf16>, vector<32x256xbf16>, vector<8x256xf32> -> vector<8x256xf32>
    %c0_13 = arith.constant 0 : index
    %c0_14 = arith.constant 0 : index
    %12 = vector.load %arg7[%c0_13, %c0_14] : memref<1x256xbf16, #tpu.memory_space<vmem>>, vector<1x256xbf16>
    %13 = arith.extf %12 : vector<1x256xbf16> to vector<1x256xf32>
    %14 = vector.broadcast %13 : vector<1x256xf32> to vector<8x256xf32>
    %15 = arith.addf %11, %14 : vector<8x256xf32>
    %16 = math.tanh %15 : vector<8x256xf32>
    %17 = arith.truncf %16 : vector<8x256xf32> to vector<8x256xbf16>
    %18 = tpu.concatenate %17, %3 in 0 : vector<8x256xbf16>, vector<8x256xbf16> -> vector<16x256xbf16>
    %c0_15 = arith.constant 0 : index
    %c0_16 = arith.constant 0 : index
    %19 = vector.load %arg11[%c0_15, %c0_16] : memref<16x64xf32, #tpu.memory_space<vmem>>, vector<16x64xf32>
    %c0_17 = arith.constant 0 : index
    %c0_18 = arith.constant 0 : index
    %20 = vector.load %arg6[%c0_17, %c0_18] : memref<256x64xbf16, #tpu.memory_space<vmem>>, vector<256x64xbf16>
    %cst_19 = arith.constant dense<0.000000e+00> : vector<16x64xf32>
    %21 = tpu.matmul %18, %20, %cst_19 {dimension_numbers = #tpu.dot_dimension_numbers<[1], [0], [0], [1], [0, 0, 1, 1], [], []>} : vector<16x256xbf16>, vector<256x64xbf16>, vector<16x64xf32> -> vector<16x64xf32>
    %22 = arith.addf %19, %21 : vector<16x64xf32>
    %c0_20 = arith.constant 0 : index
    %c0_21 = arith.constant 0 : index
    %23 = vector.load %arg11[%c0_20, %c0_21] : memref<16x64xf32, #tpu.memory_space<vmem>>, vector<16x64xf32>
    tpu.vector_store %arg11[%c0_20, %c0_21], %22 {strides = array<i32>} : memref<16x64xf32, #tpu.memory_space<vmem>>, vector<16x64xf32>,
    %c3_i32 = arith.constant 3 : i32
    %24 = arith.cmpi eq, %arg0, %c3_i32 : i32
    %25 = arith.extui %24 : i1 to i32
    %c0_i32_22 = arith.constant 0 : i32
    %26 = arith.cmpi ne, %25, %c0_i32_22 : i32
    scf.if %26 {
      %c0_23 = arith.constant 0 : index
      %c0_24 = arith.constant 0 : index
      %27 = vector.load %arg8[%c0_23, %c0_24] : memref<4x64xf32, #tpu.memory_space<vmem>>, vector<1x32xf32>
      %c1 = arith.constant 1 : index
      %c0_25 = arith.constant 0 : index
      %28 = vector.load %arg8[%c1, %c0_25] : memref<4x64xf32, #tpu.memory_space<vmem>>, vector<1x64xf32>
      %c2 = arith.constant 2 : index
      %c0_26 = arith.constant 0 : index
      %29 = vector.load %arg8[%c2, %c0_26] : memref<4x64xf32, #tpu.memory_space<vmem>>, vector<1x1xf32>
      %c3 = arith.constant 3 : index
      %c0_27 = arith.constant 0 : index
      %30 = vector.load %arg8[%c3, %c0_27] : memref<4x64xf32, #tpu.memory_space<vmem>>, vector<1x64xf32>
      %c0_28 = arith.constant 0 : index
      %c0_29 = arith.constant 0 : index
      %31 = vector.load %arg10[%c0_28, %c0_29] : memref<8x32xf32, #tpu.memory_space<vmem>>, vector<8x32xf32>
      %32 = vector.broadcast %27 : vector<1x32xf32> to vector<8x32xf32>
      %33 = arith.addf %31, %32 : vector<8x32xf32>
      %34 = arith.truncf %33 : vector<8x32xf32> to vector<8x32xbf16>
      %35 = tpu.concatenate %4, %34 in 0 : vector<8x32xbf16>, vector<8x32xbf16> -> vector<16x32xbf16>
      %c0_30 = arith.constant 0 : index
      %c0_31 = arith.constant 0 : index
      %36 = vector.load %arg5[%c0_30, %c0_31] : memref<32x64xbf16, #tpu.memory_space<vmem>>, vector<32x64xbf16>
      %cst_32 = arith.constant dense<0.000000e+00> : vector<16x64xf32>
      %37 = tpu.matmul %35, %36, %cst_32 {dimension_numbers = #tpu.dot_dimension_numbers<[1], [0], [0], [1], [0, 0, 1, 1], [], []>} : vector<16x32xbf16>, vector<32x64xbf16>, vector<16x64xf32> -> vector<16x64xf32>
      %c0_33 = arith.constant 0 : index
      %c0_34 = arith.constant 0 : index
      %38 = vector.load %arg11[%c0_33, %c0_34] : memref<16x64xf32, #tpu.memory_space<vmem>>, vector<16x64xf32>
      %39 = arith.addf %37, %38 : vector<16x64xf32>
      %40 = vector.broadcast %28 : vector<1x64xf32> to vector<16x64xf32>
      %41 = arith.addf %39, %40 : vector<16x64xf32>
      %cst_35 = arith.constant 0.000000e+00 : f32
      %42 = vector.broadcast %cst_35 : f32 to vector<16x64xf32>
      %43 = arith.maximumf %41, %42 : vector<16x64xf32>
      %44 = vector.broadcast %30 : vector<1x64xf32> to vector<16x64xf32>
      %45 = arith.mulf %43, %44 : vector<16x64xf32>
      %cst_36 = arith.constant dense<0.000000e+00> : vector<16xf32>
      %46 = vector.multi_reduction <add>, %45, %cst_36 [1] : vector<16x64xf32> to vector<16xf32>
      %47 = vector.shape_cast %46 : vector<16xf32> to vector<16x1xf32>
      %48 = vector.broadcast %29 : vector<1x1xf32> to vector<16x1xf32>
      %49 = arith.addf %47, %48 : vector<16x1xf32>
      %50 = vector.extract_strided_slice %49 {offsets = [0, 0], sizes = [8, 1], strides = [1, 1]} : vector<16x1xf32> to vector<8x1xf32>
      %51 = vector.extract_strided_slice %49 {offsets = [8, 0], sizes = [8, 1], strides = [1, 1]} : vector<16x1xf32> to vector<8x1xf32>
      %52 = tpu.iota {dimensions = array<i32: 0>} : vector<8x1xi32>
      %c2_i32 = arith.constant 2 : i32
      %53 = vector.broadcast %c2_i32 : i32 to vector<8x1xi32>
      %54 = arith.cmpi slt, %52, %53 : vector<8x1xi32>
      %cst_37 = arith.constant 0.000000e+00 : f32
      %55 = vector.broadcast %cst_37 : f32 to vector<8x1xf32>
      %56 = arith.minimumf %51, %55 : vector<8x1xf32>
      %57 = math.absf %51 : vector<8x1xf32>
      %cst_38 = arith.constant 0.000000e+00 : f32
      %58 = vector.broadcast %cst_38 : f32 to vector<8x1xf32>
      %59 = arith.subf %58, %57 : vector<8x1xf32>
      %60 = math.exp %59 : vector<8x1xf32>
      %cst_39 = arith.constant 1.000000e+00 : f32
      %61 = vector.broadcast %cst_39 : f32 to vector<8x1xf32>
      %62 = arith.addf %61, %60 : vector<8x1xf32>
      %63 = math.log %62 : vector<8x1xf32>
      %64 = arith.subf %56, %63 : vector<8x1xf32>
      %cst_40 = arith.constant 0.000000e+00 : f32
      %65 = vector.broadcast %cst_40 : f32 to vector<8x1xf32>
      %66 = arith.select %54, %64, %65 : vector<8x1xi1>, vector<8x1xf32>
      %67 = vector.shape_cast %66 : vector<8x1xf32> to vector<1x8x1xf32>
      %cst_41 = arith.constant dense<0.000000e+00> : vector<1xf32>
      %68 = vector.multi_reduction <add>, %67, %cst_41 [1, 2] : vector<1x8x1xf32> to vector<1xf32>
      %69 = vector.shape_cast %68 : vector<1xf32> to vector<1x1x1xf32>
      %70 = vector.extract %69[0, 0, 0] : f32 from vector<1x1x1xf32>
      %cst_42 = arith.constant 5.000000e-01 : f32
      %71 = arith.mulf %70, %cst_42 : f32
      %cst_43 = arith.constant -5.000000e-01 : f32
      %72 = arith.mulf %cst_43, %71 : f32
      %cst_44 = arith.constant 0.000000e+00 : f32
      %73 = vector.broadcast %cst_44 : f32 to vector<8x1xf32>
      %74 = arith.subf %73, %50 : vector<8x1xf32>
      %cst_45 = arith.constant 0.000000e+00 : f32
      %75 = vector.broadcast %cst_45 : f32 to vector<8x1xf32>
      %76 = arith.minimumf %74, %75 : vector<8x1xf32>
      %77 = math.absf %74 : vector<8x1xf32>
      %cst_46 = arith.constant 0.000000e+00 : f32
      %78 = vector.broadcast %cst_46 : f32 to vector<8x1xf32>
      %79 = arith.subf %78, %77 : vector<8x1xf32>
      %80 = math.exp %79 : vector<8x1xf32>
      %cst_47 = arith.constant 1.000000e+00 : f32
      %81 = vector.broadcast %cst_47 : f32 to vector<8x1xf32>
      %82 = arith.addf %81, %80 : vector<8x1xf32>
      %83 = math.log %82 : vector<8x1xf32>
      %84 = arith.subf %76, %83 : vector<8x1xf32>
      %cst_48 = arith.constant 0.000000e+00 : f32
      %85 = vector.broadcast %cst_48 : f32 to vector<8x1xf32>
      %86 = arith.select %54, %84, %85 : vector<8x1xi1>, vector<8x1xf32>
      %87 = vector.shape_cast %86 : vector<8x1xf32> to vector<1x8x1xf32>
      %cst_49 = arith.constant dense<0.000000e+00> : vector<1xf32>
      %88 = vector.multi_reduction <add>, %87, %cst_49 [1, 2] : vector<1x8x1xf32> to vector<1xf32>
      %89 = vector.shape_cast %88 : vector<1xf32> to vector<1x1x1xf32>
      %90 = vector.extract %89[0, 0, 0] : f32 from vector<1x1x1xf32>
      %cst_50 = arith.constant 5.000000e-01 : f32
      %91 = arith.mulf %90, %cst_50 : f32
      %cst_51 = arith.constant 5.000000e-01 : f32
      %92 = arith.mulf %cst_51, %91 : f32
      %93 = arith.subf %72, %92 : f32
      %c0_52 = arith.constant 0 : index
      %c0_53 = arith.constant 0 : index
      %94 = memref.load %arg9[%c0_52, %c0_53] : memref<1x1xf32, #tpu.memory_space<smem>>
      memref.store %93, %arg9[%c0_52, %c0_53] : memref<1x1xf32, #tpu.memory_space<smem>>
    } else {
    }
    return
  }
  func.func @transform_0(%arg0: i32) -> (i32, i32) {
    %c0_i32 = arith.constant 0 : i32
    %c0_i32_0 = arith.constant 0 : i32
    return %c0_i32, %arg0 : i32, i32
  }
  func.func @transform_1(%arg0: i32) -> (i32, i32) {
    %c0_i32 = arith.constant 0 : i32
    %c0_i32_0 = arith.constant 0 : i32
    %c0_i32_1 = arith.constant 0 : i32
    return %c0_i32, %c0_i32_0 : i32, i32
  }
  func.func @transform_2(%arg0: i32) -> (i32, i32) {
    %c0_i32 = arith.constant 0 : i32
    %c0_i32_0 = arith.constant 0 : i32
    return %arg0, %c0_i32 : i32, i32
  }
  func.func @transform_3(%arg0: i32) -> (i32, i32) {
    %c0_i32 = arith.constant 0 : i32
    %c0_i32_0 = arith.constant 0 : i32
    return %c0_i32, %arg0 : i32, i32
  }
  func.func @transform_4(%arg0: i32) -> (i32, i32) {
    %c0_i32 = arith.constant 0 : i32
    %c0_i32_0 = arith.constant 0 : i32
    %c0_i32_1 = arith.constant 0 : i32
    return %c0_i32, %c0_i32_0 : i32, i32
  }
  func.func @transform_5(%arg0: i32) -> (i32, i32) {
    %c0_i32 = arith.constant 0 : i32
    %c0_i32_0 = arith.constant 0 : i32
    return %arg0, %c0_i32 : i32, i32
  }
  func.func @transform_6(%arg0: i32) -> (i32, i32) {
    %c0_i32 = arith.constant 0 : i32
    %c0_i32_0 = arith.constant 0 : i32
    return %c0_i32, %arg0 : i32, i32
  }
  func.func @transform_7(%arg0: i32) -> (i32, i32) {
    %c0_i32 = arith.constant 0 : i32
    %c0_i32_0 = arith.constant 0 : i32
    %c0_i32_1 = arith.constant 0 : i32
    return %c0_i32, %c0_i32_0 : i32, i32
  }
  func.func @transform_8(%arg0: i32) -> (i32, i32) {
    %c0_i32 = arith.constant 0 : i32
    %c0_i32_0 = arith.constant 0 : i32
    %c0_i32_1 = arith.constant 0 : i32
    return %c0_i32, %c0_i32_0 : i32, i32
  }
}

</mosaic_0001>

<bundles_post_ra>
// kernel: tpu_custom_call.1
= control target key start
LH: loop header
LB: loop body
LE: loop exit
PB: predicated region body
PF: predicated region fallthrough
CT: control target
= control target key end

     0   :  { %s2408_s0 = inlined_call_operand.hbm [shape: bf16[8,1024], index: 0, kind: input, shape index: {}]   ;;  %s2409_s1 = inlined_call_operand.hbm [shape: bf16[8,32], index: 1, kind: input, shape index: {}]   ;;  %s2410_s2 = inlined_call_operand.hbm [shape: bf16[1024,32], index: 2, kind: input, shape index: {}]   ;;  %s2411_s3 = inlined_call_operand.hbm [shape: bf16[32,1024], index: 3, kind: input, shape index: {}]   ;;  %s2412_s4 = inlined_call_operand.hbm [shape: bf16[32,64], index: 4, kind: input, shape index: {}]   ;;  %s2413_s5 = inlined_call_operand.hbm [shape: bf16[1024,64], index: 5, kind: input, shape index: {}]   ;;  %s2414_s6 = inlined_call_operand.hbm [shape: bf16[1,1024], index: 6, kind: input, shape index: {}]   ;;  %s2415_s7 = inlined_call_operand.hbm [shape: f32[4,64], index: 7, kind: input, shape index: {}]   ;;  %s2416_s8 = inlined_call_operand.hbm [shape: f32[1,1], index: 8, kind: output, shape index: {}]  }
   0x1   :  { %2440 = sst [smem:[#allocation30_spill]] %s2408_s0 }
   0x2   :  { %2441 = sst [smem:[#allocation31_spill]] %s2409_s1 }
   0x3   :  { %2442 = sst [smem:[#allocation32_spill]] %s2410_s2 }
   0x4   :  { %2443 = sst [smem:[#allocation33_spill]] %s2416_s8 }
   0x5   :  { %13 = vsyncpa [#allocation5], 0 }
   0x6   :  { %15 = vsyncpa [#allocation5 + $0x1], 0 }
   0x7   :  { %16 = vsyncpa [#allocation8], 0 }
   0x8   :  { %17 = vsyncpa [#allocation13], 0 }
   0x9   :  { %19 = vsyncpa [#allocation13 + $0x1], 0 }
   0xa   :  { %20 = vsyncpa [#allocation16], 0 }
   0xb   :  { %21 = vsyncpa [#allocation6], 0  ;;  %s1974_s27 = smov 0   ;;  %s1976_s28 = smov 0  }
   0xc   :  { %s1978_s29 = smov 0   ;;  %s1980_s30 = smov 0  }
   0xd LB: > { %2444 = sst [smem:[#allocation25_spill]] %s1901_s28  ;;  %s1995_s9 = sadd.s32 1, %s1909_s30   ;;  %s1909_s30 = sphi %s1980_s30, %s2479_s30   ;;  %s1905_s29 = sphi %s1978_s29, %s2482_s29   ;;  %s1901_s28 = sphi %s1976_s28, %s2481_s28   ;;  %s1897_s27 = sphi %s1974_s27, %s2480_s27  }
   0xe   : > { %2445 = sst [smem:[#allocation26_spill]] %s1905_s29  ;;  %s34_s10 = sadd.s32 1, %s1905_s29 }
   0xf   : > { %2446 = sst [smem:[#allocation27_spill]] %s1995_s9  ;;  %s31_s11 = ssub.s32 %s1909_s30, %s1995_s9 }
  0x10   : > { %p41_p0 = scmp.ne.s32.totalorder %s1905_s29, %s1901_s28  ;;  %p32_p1 = scmp.eq.s32.totalorder %s31_s11, 0 }
  0x11   : > { %p42_p2 = scmp.eq.s32.totalorder %s1909_s30, 0  ;;  %p1500_p3 = scmp.lt.s32.totalorder %s1909_s30, 4 }
  0x12   : > { %s2005_s12 = scalar_select %p32_p1, %s1905_s29, %s34_s10  }
  0x13   : > { %p43_p4 = por %p42_p2, %p41_p0  ;;  %s2417_s13 = sand.u32 1, %s1909_s30  }
  0x14   : > { %2447 = sst [smem:[#allocation28_spill]] %s2005_s12  ;;  %s2009_s14 = sand.u32 1, %s1905_s29  }
  0x15   : > { %s1305_s15 = sshll.u32 %s2009_s14, 3  ;;  %s1381_s16 = sshll.u32 %s1909_s30, 7 }
  0x16   : > { %s2448_s0 = sld [smem:[#allocation30_spill]]  ;;  %s298_s20 = scalar_lea.vmem [#allocation4], %s1305_s15 }
  0x17   : > { %s306_s21 = sshll.u32 %s298_s20, 4  ;;  %p2020_p5 = pnand %p1500_p3, %p43_p4  ;;  %s2024_s21 = int_to_ptr.vmem [resolvable:$true] %s306_s21 }
  0x18   : > { %s1308_s23 = sshll.u32 %s2009_s14, 7  ;;  %s1311_s24 = sshll.u32 %s2009_s14, 5 }
  0x19   : > { %s2449_s22 = scalar_select %p2020_p5, 1, 0 }
  0x1a   : > { %s2030_s25 = scalar_lea.sflag [#allocation5], %s2417_s13  ;;  %p2036_p7 = pneg %p2020_p5 }
  0x1c   : > { %s2018_s19 = scalar_lea.hbm %s2448_s0, %s1381_s16  ;;  %s1610_s17 = scalar_lea.hbm %s2448_s0, 512 }
  0x1d   : > { %s1605_s26 = scalar_lea.hbm %s2018_s19, 128  ;;  %p1611_p10 = scmp.lt.u32.totalorder %s2018_s19, %s2448_s0 }
  0x1e   : > { %p1606_p6 = scmp.ne.s32.totalorder %s2018_s19, %s1605_s26  ;;  %p1612_p11 = scmp.lt.u32.totalorder %s1610_s17, %s1605_s26 }
  0x1f   : > { %s2450_s10 = scalar_select %p2036_p7, 1, 0 }
  0x20   : > { %p1608_p8 = pnand %p2036_p7, %p1606_p6  ;;  %p1613_p12 = por %p1612_p11, %p1611_p10 }
  0x21   : > { %p1614_p13 = scmp.lt.u32.totalorder %s1605_s26, %s2018_s19 }
  0x22   : > { %p1609_p9 = pneg %p1608_p8 }
  0x23   : > { %p1615_p0 = por %p1614_p13, %p1613_p12 }
  0x25   : > { %p1616_p1 = pnand %p1615_p0, %p1609_p9 }
  0x27   : > { %1619 = shalt.err (!%p1616_p1)
}
  0x28   : > { %s1620_s13 = scalar_lea.vmem %s2024_s21, 128  ;;  %s1911_s11 = smov [#allocation4]  }
  0x29   : > { %p1621_p2 = scmp.ne.s32.totalorder %s2024_s21, %s1620_s13  ;;  %s1625_s15 = sshll.u32 %s1911_s11, 4  ;;  %s1626_s15 = int_to_ptr.vmem [resolvable:$false] %s1625_s15 }
  0x2a   : > { %s1627_s18 = scalar_lea.vmem %s1626_s15, 256  ;;  %p1628_p6 = scmp.lt.s32.totalorder %s2024_s21, %s1626_s15 }
  0x2b   : > { %p1623_p3 = pnand %p1621_p2, %p2036_p7  ;;  %p1629_p8 = scmp.lt.s32.totalorder %s1627_s18, %s1620_s13 }
  0x2d   : > { %p1624_p4 = pneg %p1623_p3  ;;  %p1630_p10 = por %p1629_p8, %p1628_p6 }
  0x2f   : > { %p1631_p11 = pnand %p1630_p10, %p1624_p4 }
  0x31   : > { %1634 = shalt.err (!%p1631_p11)
}
  0x32   : > { %1484 = dma.hbm_to_vmem [thread:$0]  (!%p2020_p5), %s2018_s19, 128, %s2024_s21, %s2030_s25  }
  0x33   : > { %s2065_s13 = scalar_lea.hbm %s2411_s3, %s1381_s16  ;;  %s338_s20 = scalar_lea.vmem [#allocation10], %s1311_s24 }
  0x34   : > { %s345_s11 = sshll.u32 %s338_s20, 4  ;;  %s2072_s15 = sadd.s32 4294967295, %s1909_s30   ;;  %s2069_s11 = int_to_ptr.vmem [resolvable:$true] %s345_s11 }
  0x35   : > { %p47_p9 = scmp.ne.s32.totalorder %s1901_s28, %s1897_s27  ;;  %p2425_p12 = scmp.eq.s32.totalorder %s2072_s15, 0 }
  0x36   : > { %p1300_p13 = scmp.ge.s32.totalorder %s1909_s30, 1  ;;  %p246_p0 = scmp.lt.s32.totalorder %s1909_s30, 5 }
  0x37   : > { %p2081_p1 = por %p2425_p12, %p47_p9  ;;  %s1912_s21 = smov [#allocation7]  }
  0x38   : > { %p2086_p3 = pnand %p1300_p13, %p246_p0  ;;  %s259_s24 = sshll.u32 %s1912_s21, 4  ;;  %s260_s24 = int_to_ptr.vmem [resolvable:$true] %s259_s24 }
  0x39   : > { %s2451_s16 = scalar_select %p2081_p1, 1, 0 }
  0x3a   : > { %s2453_s19 = scalar_select %p2086_p3, 1, 0 }
  0x3b   : > { %2452 = sst [smem:[#allocation29_spill]] %s2451_s16  ;;  %p1471_p4 = pneg %p2086_p3 }
  0x3c   : > { %s1382_s18 = sshll.u32 %s1909_s30, 11  ;;  %s2455_s2 = sld [smem:[#allocation32_spill]] }
  0x3d   : > { %p2094_p6 = pnand %p1471_p4, %p2425_p12  ;;  %s317_s0 = scalar_lea.vmem [#allocation9], %s1308_s23 }
  0x3e   : > { %s324_s12 = sshll.u32 %s317_s0, 4  ;;  %s2456_s1 = sld [smem:[#allocation31_spill]]  ;;  %s2108_s12 = int_to_ptr.vmem [resolvable:$true] %s324_s12 }
  0x3f   : > { %s2454_s27 = scalar_select %p2094_p6, 1, 0 }
  0x40   : > { %p2118_p10 = pneg %p2094_p6 }
  0x42   : > { %s2104_s20 = scalar_lea.hbm %s2455_s2, %s1382_s18 }
  0x43   : > { %s2457_s28 = scalar_select %p2118_p10, 1, 0 }
  0x44   : > { %s1635_s9 = scalar_lea.hbm %s2456_s1, 64 }
  0x45   : > { %p1636_p8 = scmp.ne.s32.totalorder %s2456_s1, %s1635_s9  ;;  %p1642_p13 = scmp.lt.u32.totalorder %s1635_s9, %s2456_s1 }
  0x47   : > { %p1638_p11 = pnand %p2118_p10, %p1636_p8 }
  0x49   : > { %p1639_p9 = pneg %p1638_p11 }
  0x4b   : > { %p1644_p0 = pnand %p1642_p13, %p1639_p9 }
  0x4d   : > { %1647 = shalt.err (!%p1644_p0)
}
  0x4e   : > { %s1648_s29 = scalar_lea.vmem %s260_s24, 64  ;;  %p1656_p1 = scmp.lt.s32.totalorder %s260_s24, %s260_s24 }
  0x4f   : > { %p1649_p4 = scmp.ne.s32.totalorder %s260_s24, %s1648_s29  ;;  %p1657_p3 = scmp.lt.s32.totalorder %s1648_s29, %s1648_s29 }
  0x51   : > { %p1651_p2 = pnand %p1649_p4, %p2118_p10  ;;  %p1658_p5 = por %p1657_p3, %p1656_p1 }
  0x53   : > { %p1652_p12 = pneg %p1651_p2 }
  0x55   : > { %p1659_p7 = pnand %p1658_p5, %p1652_p12 }
  0x57   : > { %1662 = shalt.err (!%p1659_p7)
}
  0x58   : > { %1474 = dma.hbm_to_vmem [thread:$0]  (!%p2094_p6), %s2456_s1, 64, %s260_s24, [#allocation8]  }
  0x59   : > { %s1663_s9 = scalar_lea.hbm %s2104_s20, 2048  ;;  %p2458_p11 = scmp.ne.s32.totalorder %s2450_s10, 0 }
  0x5a   : > { %p1664_p8 = scmp.ne.s32.totalorder %s2104_s20, %s1663_s9  ;;  %s1668_s0 = scalar_lea.hbm %s2455_s2, 8192 }
  0x5b   : > { %p1669_p5 = scmp.lt.u32.totalorder %s2104_s20, %s2455_s2  ;;  %p1670_p7 = scmp.lt.u32.totalorder %s1668_s0, %s1663_s9 }
  0x5c   : > { %p1666_p2 = pnand %p1664_p8, %p2458_p11  ;;  %p1672_p1 = scmp.lt.u32.totalorder %s1663_s9, %s2104_s20 }
  0x5d   : > { %p1671_p12 = por %p1670_p7, %p1669_p5 }
  0x5e   : > { %p1667_p9 = pneg %p1666_p2 }
  0x5f   : > { %p1673_p3 = por %p1672_p1, %p1671_p12 }
  0x61   : > { %p1674_p13 = pnand %p1673_p3, %p1667_p9 }
  0x63   : > { %1677 = shalt.err (!%p1674_p13)
}
  0x64   : > { %s1678_s24 = scalar_lea.vmem %s2108_s12, 2048  ;;  %s1913_s8 = smov [#allocation9]  }
  0x65   : > { %p1679_p0 = scmp.ne.s32.totalorder %s2108_s12, %s1678_s24  ;;  %s1683_s16 = sshll.u32 %s1913_s8, 4  ;;  %s1684_s16 = int_to_ptr.vmem [resolvable:$false] %s1683_s16 }
  0x66   : > { %s1685_s17 = scalar_lea.vmem %s1684_s16, 4096  ;;  %p1686_p2 = scmp.lt.s32.totalorder %s2108_s12, %s1684_s16 }
  0x67   : > { %p1681_p4 = pnand %p1679_p0, %p2458_p11  ;;  %p1687_p6 = scmp.lt.s32.totalorder %s1685_s17, %s1678_s24 }
  0x69   : > { %p1682_p8 = pneg %p1681_p4  ;;  %p1688_p5 = por %p1687_p6, %p1686_p2 }
  0x6b   : > { %p1689_p7 = pnand %p1688_p5, %p1682_p8 }
  0x6d   : > { %1692 = shalt.err (!%p1689_p7)
}
  0x6e   : > { %s2434_s9 = smov 64   ;;  %s1915_s21 = smov 4  }
  0x6f   : > { %p2459_p9 = scmp.ne.s32.totalorder %s2449_s22, 0  ;;  %s2164_s29 = scalar_lea.hbm %s2413_s5, %s1382_s18 }
  0x70   : > { %s359_s24 = scalar_lea.vmem [#allocation12], %s1308_s23  ;;  %s1916_s16 = smov [#allocation11]  }
  0x71   : > { %1487 = dma.hbm_to_vmem [thread:$0]  (!%p2459_p9), %s2104_s20, 2048, %s2108_s12, %s2030_s25, %s2434_s9, %s2434_s9, %s1915_s21  }
  0x72   : > { %s366_s8 = sshll.u32 %s359_s24, 4  ;;  %s2170_s17 = sshll.u32 %s1916_s16, 4  ;;  %s2168_s8 = int_to_ptr.vmem [resolvable:$true] %s366_s8  ;;  %s270_s17 = int_to_ptr.vmem [resolvable:$true] %s2170_s17 }
  0x73   : > { %s2460_s1 = sand.u32 1, %s1909_s30   ;;  %s1693_s20 = scalar_lea.hbm %s2164_s29, 2048 }
  0x74   : > { %s2174_s12 = scalar_lea.sflag [#allocation13], %s2460_s1  ;;  %p1694_p6 = scmp.ne.s32.totalorder %s2164_s29, %s1693_s20 }
  0x75   : > { %s1698_s26 = scalar_lea.hbm %s2413_s5, 8192  ;;  %p1699_p3 = scmp.lt.u32.totalorder %s2164_s29, %s2413_s5 }
  0x76   : > { %p1696_p12 = pnand %p1694_p6, %p2458_p11  ;;  %p1700_p13 = scmp.lt.u32.totalorder %s1698_s26, %s1693_s20 }
  0x77   : > { %p1702_p4 = scmp.lt.u32.totalorder %s1693_s20, %s2164_s29 }
  0x78   : > { %p1697_p1 = pneg %p1696_p12  ;;  %p1701_p0 = por %p1700_p13, %p1699_p3 }
  0x7a   : > { %p1703_p8 = por %p1702_p4, %p1701_p0 }
  0x7c   : > { %p1704_p2 = pnand %p1703_p8, %p1697_p1 }
  0x7e   : > { %1707 = shalt.err (!%p1704_p2)
}
  0x7f   : > { %s1708_s1 = scalar_lea.vmem %s2168_s8, 2048  ;;  %s1917_s24 = smov [#allocation12]  }
  0x80   : > { %p1709_p5 = scmp.ne.s32.totalorder %s2168_s8, %s1708_s1  ;;  %s1713_s16 = sshll.u32 %s1917_s24, 4  ;;  %s1714_s16 = int_to_ptr.vmem [resolvable:$false] %s1713_s16 }
  0x81   : > { %s1715_s9 = scalar_lea.vmem %s1714_s16, 4096  ;;  %p1716_p12 = scmp.lt.s32.totalorder %s2168_s8, %s1714_s16 }
  0x82   : > { %p1711_p7 = pnand %p1709_p5, %p2458_p11  ;;  %p1717_p10 = scmp.lt.s32.totalorder %s1715_s9, %s1708_s1 }
  0x84   : > { %p1712_p6 = pneg %p1711_p7  ;;  %p1718_p3 = por %p1717_p10, %p1716_p12 }
  0x86   : > { %p1719_p13 = pnand %p1718_p3, %p1712_p6 }
  0x88   : > { %1722 = shalt.err (!%p1719_p13)
}
  0x89   : > { %s2461_s20 = smov 64   ;;  %s1723_s26 = scalar_lea.hbm %s2412_s4, 256 }
  0x8a   : > { %1493 = dma.hbm_to_vmem [thread:$0]  (!%p2459_p9), %s2164_s29, 2048, %s2168_s8, %s2174_s12, %s2461_s20, %s2461_s20, %s1915_s21  }
  0x8b   : > { %p1724_p10 = scmp.ne.s32.totalorder %s2412_s4, %s1723_s26  ;;  %p2462_p1 = scmp.ne.s32.totalorder %s2457_s28, 0 }
  0x8c   : > { %p1730_p8 = scmp.lt.u32.totalorder %s1723_s26, %s2412_s4 }
  0x8d   : > { %p1726_p0 = pnand %p1724_p10, %p2462_p1 }
  0x8f   : > { %p1727_p4 = pneg %p1726_p0 }
  0x91   : > { %p1732_p2 = pnand %p1730_p8, %p1727_p4 }
  0x93   : > { %1735 = shalt.err (!%p1732_p2)
}
  0x94   : > { %s1736_s9 = scalar_lea.vmem %s270_s17, 256  ;;  %p1744_p12 = scmp.lt.s32.totalorder %s270_s17, %s270_s17 }
  0x95   : > { %p1737_p5 = scmp.ne.s32.totalorder %s270_s17, %s1736_s9  ;;  %p1745_p3 = scmp.lt.s32.totalorder %s1736_s9, %s1736_s9 }
  0x97   : > { %p1739_p7 = pnand %p1737_p5, %p2462_p1  ;;  %p1746_p13 = por %p1745_p3, %p1744_p12 }
  0x99   : > { %p1740_p6 = pneg %p1739_p7 }
  0x9b   : > { %p1747_p9 = pnand %p1746_p13, %p1740_p6 }
  0x9d   : > { %1750 = shalt.err (!%p1747_p9)
}
  0x9e   : > { %p2463_p10 = scmp.ne.s32.totalorder %s2454_s27, 0  ;;  %s1918_s18 = smov [#allocation15]  }
  0x9f   : > { %s283_s0 = sshll.u32 %s1918_s18, 4  ;;  %s1751_s1 = scalar_lea.hbm %s2415_s7, 64  ;;  %s284_s0 = int_to_ptr.vmem [resolvable:$true] %s283_s0 }
  0xa0   : > { %1477 = dma.hbm_to_vmem [thread:$0]  (!%p2463_p10), %s2412_s4, 256, %s270_s17, [#allocation8], %s2461_s20, %s2461_s20, %s1915_s21  }
  0xa1   : > { %p1752_p9 = scmp.ne.s32.totalorder %s2415_s7, %s1751_s1  ;;  %p1758_p8 = scmp.lt.u32.totalorder %s1751_s1, %s2415_s7 }
  0xa3   : > { %p1754_p0 = pnand %p1752_p9, %p2462_p1 }
  0xa5   : > { %p1755_p4 = pneg %p1754_p0 }
  0xa7   : > { %p1760_p2 = pnand %p1758_p8, %p1755_p4 }
  0xa9   : > { %1763 = shalt.err (!%p1760_p2)
}
  0xaa   : > { %s1764_s21 = scalar_lea.vmem %s284_s0, 64  ;;  %p1772_p12 = scmp.lt.s32.totalorder %s284_s0, %s284_s0 }
  0xab   : > { %p1765_p5 = scmp.ne.s32.totalorder %s284_s0, %s1764_s21  ;;  %p1773_p3 = scmp.lt.s32.totalorder %s1764_s21, %s1764_s21 }
  0xad   : > { %p1767_p7 = pnand %p1765_p5, %p2462_p1  ;;  %p1774_p13 = por %p1773_p3, %p1772_p12 }
  0xaf   : > { %p1768_p6 = pneg %p1767_p7 }
  0xb1   : > { %p1775_p11 = pnand %p1774_p13, %p1768_p6 }
  0xb3   : > { %1778 = shalt.err (!%p1775_p11)
}
  0xb4   : > { %1480 = dma.hbm_to_vmem [thread:$0]  (!%p2463_p10), %s2415_s7, 64, %s284_s0, [#allocation16]  }
  0xb5   : > { %s1317_s2 = sshll.u32 %s2009_s14, 1  ;;  %s1779_s28 = scalar_lea.hbm %s2065_s13, 512 }
  0xb6   : > { %p1780_p1 = scmp.ne.s32.totalorder %s2065_s13, %s1779_s28  ;;  %p2464_p9 = scmp.ne.s32.totalorder %s2450_s10, 0 }
  0xb7   : > { %s1784_s27 = scalar_lea.hbm %s2411_s3, 2048  ;;  %p1785_p11 = scmp.lt.u32.totalorder %s2065_s13, %s2411_s3 }
  0xb8   : > { %p1782_p0 = pnand %p1780_p1, %p2464_p9  ;;  %p1786_p8 = scmp.lt.u32.totalorder %s1784_s27, %s1779_s28 }
  0xb9   : > { %p1788_p5 = scmp.lt.u32.totalorder %s1779_s28, %s2065_s13 }
  0xba   : > { %p1783_p4 = pneg %p1782_p0  ;;  %p1787_p2 = por %p1786_p8, %p1785_p11 }
  0xbc   : > { %p1789_p7 = por %p1788_p5, %p1787_p2 }
  0xbe   : > { %p1790_p6 = pnand %p1789_p7, %p1783_p4 }
  0xc0   : > { %1793 = shalt.err (!%p1790_p6)
}
  0xc1   : > { %s1794_s0 = scalar_lea.vmem %s2069_s11, 512  ;;  %s1919_s23 = smov [#allocation10]  }
  0xc2   : > { %p1795_p10 = scmp.ne.s32.totalorder %s2069_s11, %s1794_s0  ;;  %s1799_s1 = sshll.u32 %s1919_s23, 4  ;;  %s1800_s1 = int_to_ptr.vmem [resolvable:$false] %s1799_s1 }
  0xc3   : > { %s1801_s24 = scalar_lea.vmem %s1800_s1, 1024  ;;  %p1802_p13 = scmp.lt.s32.totalorder %s2069_s11, %s1800_s1 }
  0xc4   : > { %p1797_p12 = pnand %p1795_p10, %p2464_p9  ;;  %p1803_p1 = scmp.lt.s32.totalorder %s1801_s24, %s1794_s0 }
  0xc6   : > { %p1798_p3 = pneg %p1797_p12  ;;  %p1804_p0 = por %p1803_p1, %p1802_p13 }
  0xc8   : > { %p1805_p11 = pnand %p1804_p0, %p1798_p3 }
  0xca   : > { %1808 = shalt.err (!%p1805_p11)
}
  0xcb   : > { %s1920_s16 = smov 512   ;;  %s1921_s9 = smov 128  }
  0xcc   : > { %s1922_s21 = smov 8   ;;  %p2465_p4 = scmp.ne.s32.totalorder %s2449_s22, 0 }
  0xcd   : > { %s1385_s17 = sshll.u32 %s1909_s30, 5  ;;  %s380_s8 = scalar_lea.vmem [#allocation14], %s1317_s2 }
  0xce   : > { %1490 = dma.hbm_to_vmem [thread:$0]  (!%p2465_p4), %s2065_s13, 512, %s2069_s11, %s2030_s25, %s1920_s16, %s1921_s9, %s1922_s21  }
  0xcf   : > { %s2268_s29 = scalar_lea.hbm %s2414_s6, %s1385_s17  ;;  %s388_s27 = sshll.u32 %s380_s8, 4  ;;  %s389_s27 = int_to_ptr.vmem [resolvable:$true] %s388_s27 }
  0xd0   : > { %s1809_s18 = scalar_lea.hbm %s2268_s29, 32  ;;  %s1814_s13 = scalar_lea.hbm %s2414_s6, 128 }
  0xd1   : > { %p1810_p8 = scmp.ne.s32.totalorder %s2268_s29, %s1809_s18  ;;  %p1815_p7 = scmp.lt.u32.totalorder %s2268_s29, %s2414_s6 }
  0xd2   : > { %p1816_p6 = scmp.lt.u32.totalorder %s1814_s13, %s1809_s18  ;;  %p1818_p12 = scmp.lt.u32.totalorder %s1809_s18, %s2268_s29 }
  0xd3   : > { %p1812_p2 = pnand %p1810_p8, %p2464_p9 }
  0xd4   : > { %p1817_p10 = por %p1816_p6, %p1815_p7 }
  0xd5   : > { %p1813_p5 = pneg %p1812_p2 }
  0xd6   : > { %p1819_p3 = por %p1818_p12, %p1817_p10 }
  0xd8   : > { %p1820_p13 = pnand %p1819_p3, %p1813_p5 }
  0xda   : > { %1823 = shalt.err (!%p1820_p13)
}
  0xdb   : > { %s1824_s14 = scalar_lea.vmem %s389_s27, 32  ;;  %s1923_s2 = smov [#allocation14]  }
  0xdc   : > { %p1825_p1 = scmp.ne.s32.totalorder %s389_s27, %s1824_s14  ;;  %s1829_s0 = sshll.u32 %s1923_s2, 4  ;;  %s1830_s0 = int_to_ptr.vmem [resolvable:$false] %s1829_s0 }
  0xdd   : > { %s1831_s23 = scalar_lea.vmem %s1830_s0, 64  ;;  %p1832_p8 = scmp.lt.s32.totalorder %s389_s27, %s1830_s0 }
  0xde   : > { %p1827_p0 = pnand %p1825_p1, %p2464_p9  ;;  %p1833_p2 = scmp.lt.s32.totalorder %s1831_s23, %s1824_s14 }
  0xe0   : > { %p1828_p11 = pneg %p1827_p0  ;;  %p1834_p4 = por %p1833_p2, %p1832_p8 }
  0xe2   : > { %p1835_p6 = pnand %p1834_p4, %p1828_p11 }
  0xe4   : > { %1838 = shalt.err (!%p1835_p6)
}
  0xe5   : > { %p2466_p7 = scmp.ne.s32.totalorder %s2449_s22, 0  ;;  %p2467_p5 = scmp.ne.s32.totalorder %s2453_s19, 0 }
  0xe6   : > { %s2468_s10 = sld [smem:[#allocation25_spill]] (!%p2467_p5)  ;;  %s2469_s1 = sld [smem:[#allocation29_spill]] (!%p2467_p5) }
  0xe7   : > { %1496 = dma.hbm_to_vmem [thread:$0]  (!%p2466_p7), %s2268_s29, 32, %s389_s27, %s2174_s12  }
  0xe8   : > { %397 = sbr.rel (%p2467_p5) target bundleno = 1171 (0x493), region = 52  ;;  %s399_s24 = sand.u32 (!%p2467_p5), 1, %s2072_s15  }
  0xe9   : > { %s400_s21 = scalar_lea.sflag (!%p2467_p5), [#allocation5], %s399_s24 }
  0xec   : > { %s401_s16 = sand.u32 (!%p2467_p5), 1, %s2468_s10   ;;  %p2470_p9 = scmp.ne.s32.totalorder (!%p2467_p5), %s2469_s1, 0 }
  0xed   : > { %s1321_s9 = sshll.u32 (!%p2467_p5), %s401_s16, 3 }
  0xee   : > { %s2294_s17 = scalar_lea.vmem (!%p2467_p5), [#allocation4], %s1321_s9 }
  0xef   : > { %1868 = dma.done.wait (%p2470_p9), %s400_s21, 128  }
  0xf0   : > { %1870 = vsyncadd (%p2470_p9), %s400_s21, 4294967168  ;;  %p2471_p4 = scmp.eq.s32.totalorder %s2072_s15, 0 }
  0xf2   : > { %1872 = dma.done.wait (%p2471_p4), [#allocation8], 64   ;;  %p2472_p10 = pmov %p2471_p4 }
  0xf3   : > { %s1323_s22 = sshll.u32 %s401_s16, 7 }
  0xf4   : > { %1874 = vsyncadd (%p2472_p10), [#allocation8], 4294967232  ;;  %s2304_s19 = scalar_lea.vmem [#allocation9], %s1323_s22 }
  0xf5   : > { %1876 = dma.done.wait (%p2470_p9), %s400_s21, 2560  }
  0xf6   : > { %1878 = vsyncadd (%p2470_p9), %s400_s21, 4294964736  ;;  %s1324_s12 = sshll.u32 %s401_s16, 5  ;;  %p2473_p12 = pmov %p2471_p4 }
  0xf7   : > { %s425_s20 = scalar_lea.vmem [#allocation10], %s1324_s12 }
  0xf8   : > { %1880 = dma.done.wait (%p2473_p12), [#allocation8], 256   ;;  %p2474_p3 = pmov %p2471_p4 }
  0xf9   : > { %s435_s28 = scalar_lea.sflag [#allocation13], %s399_s24  ;;  %s2314_s29 = scalar_lea.vmem [#allocation12], %s1323_s22 }
  0xfa   : > { %1882 = vsyncadd (%p2474_p3), [#allocation8], 4294967040 }
  0xfb   : > { %1884 = dma.done.wait (%p2470_p9), %s435_s28, 2080  }
  0xfc   : > { %1886 = vsyncadd (%p2470_p9), %s435_s28, 4294965216  ;;  %s1327_s8 = sshll.u32 %s401_s16, 1  ;;  %p2475_p13 = pmov %p2474_p3 }
  0xfd   : > { %s2320_s27 = scalar_lea.vmem [#allocation14], %s1327_s8 }
  0xfe   : > { %1888 = dma.done.wait (%p2475_p13), [#allocation16], 64   ;;  %p2476_p1 = pmov %p2474_p3 }
  0xff   : > { %p2477_p0 = scmp.ne.s32.totalorder %s2072_s15, 0 }
 0x100   : > { %1890 = vsyncadd (%p2476_p1), [#allocation16], 4294967232  ;;  %vm509_vm0 = vcmask (!%p2477_p0), 261120   ;;  %vm511_vm1 = vcmask (!%p2477_p0), 523264   ;;  %v1924_v0 = vmov (!%p2477_p0), 0.0  }
 0x101   : > { %508 = sbr.rel (%p2477_p0) target bundleno = 264 (0x108), region = 88  ;;  %510 = vst.msk [vmem:[#allocation2] sm:$0xff] (!%p2477_p0), %vm509_vm0, %v1924_v0 }
 0x102   : > { %512 = vst.msk [vmem:[#allocation3] sm:$0xff] (!%p2477_p0), %vm511_vm1, %v1924_v0  ;;  %513 = vst.msk [vmem:[#allocation3 + $0x8] sm:$0xff] (!%p2477_p0), %vm511_vm1, %v1924_v0 }
 0x108 PF: > { %v1551_v1 = vld [vmem:[%s425_s20 + $0x4] ss:$8 sps:$4 sm:$0xff]   ;;  %v1553_v2 = vld [vmem:[%s425_s20] ss:$8 sps:$4 sm:$0xff]   ;;  %v1925_v3 = vmov 0   ;;  %v1559_v9 = vld [vmem:[%s2314_s29 + $0x40] sm:$0xff]   ;;  %v702_v42 = vlaneseq }
 0x109   : > { %775 = vmatprep.mubr.bf16.mxu1 %v1925_v3  ;;  %743 = vmatprep.subr.bf16.mxu1 %v1551_v1  ;;  %v1554_v4 = vld [vmem:[%s425_s20 + $0x14] ss:$8 sps:$4 sm:$0xff]   ;;  %v1556_v5 = vld [vmem:[%s425_s20 + $0x10] ss:$8 sps:$4 sm:$0xff]   ;;  %v1557_v6 = vld [vmem:[%s2304_s19 + $0x40] sm:$0xff]   ;;  %vm693_vm2 = vcmask 261120  }
 0x10a   : > { %744 = vmatpush1.bf16.msra.mxu1 %v1553_v2  ;;  %v1558_v7 = vld [vmem:[%s2304_s19] sm:$0xff]   ;;  %v2330_v8 = vld [vmem:[#allocation7] sm:$0xf]  ;;  %1386 = vmatprep.subr.bf16.mxu0 %v1557_v6  ;;  %v1560_v10 = vld [vmem:[%s2314_s29] sm:$0xff]   ;;  %v2365_v43 = vshrl.u32 %v702_v42, 7  ;;  %vm788_vm3 = vcmask 1043456  }
 0x10b   : > { %745 = vmatprep.subr.bf16.mxu1 %v1554_v4  ;;  %1387 = vmatpush3.bf16.msra.mxu0 %v1558_v7  ;;  %v1561_v11 = vld [vmem:[%s2304_s19 + $0x48] sm:$0xff]   ;;  %v1563_v13 = vld [vmem:[%s2314_s29 + $0x48] sm:$0xff]   ;;  %v1565_v15 = vld [vmem:[%s2304_s19 + $0x50] sm:$0xff]   ;;  %vm970_vm4 = vcmask 523264   ;;  %p1369_p11 = scmp.ne.s32.totalorder %s2072_s15, 3 }
 0x10c   : > { %v1562_v12 = vld [vmem:[%s2304_s19 + $0x8] sm:$0xff]   ;;  %1388 = vmatprep.subr.bf16.mxu0 %v1561_v11  ;;  %v1564_v14 = vld [vmem:[%s2314_s29 + $0x8] sm:$0xff]   ;;  %v1566_v16 = vld [vmem:[%s2304_s19 + $0x10] sm:$0xff]   ;;  %v704_v46 = vsub.s32 0, %v2365_v43  ;;  %v708_v47 = vsub.s32 2, %v2365_v43  ;;  %vm1927_vm5 = vmmov (!%p1369_p11), 0  }
 0x10d   : > { %v1567_v17 = vld [vmem:[%s2314_s29 + $0x50] sm:$0xff]   ;;  %v1569_v19 = vld [vmem:[%s2304_s19 + $0x58] sm:$0xff]   ;;  %v1571_v21 = vld [vmem:[%s2314_s29 + $0x58] sm:$0xff]   ;;  %vm1081_vm6 = vcmp.lt.s32.totalorder (!%p1369_p11), %v2365_v43, 2  ;;  %vm1092_vm7 = vcmask (!%p1369_p11), 7168  }
 0x10e   : > { %746 = vmatpush1.bf16.msra.mxu1 %v1556_v5  ;;  %v1568_v18 = vld [vmem:[%s2314_s29 + $0x10] sm:$0xff]   ;;  %v1570_v20 = vld [vmem:[%s2304_s19 + $0x18] sm:$0xff]   ;;  %v1572_v22 = vld [vmem:[%s2314_s29 + $0x18] sm:$0xff]  }
 0x10f   : > { %1408 = vmatprep.subr.bf16.mxu1 %v1559_v9  ;;  %1389 = vmatpush3.bf16.msra.mxu0 %v1562_v12  ;;  %v1573_v23 = vld [vmem:[%s2304_s19 + $0x60] sm:$0xff]   ;;  %v1575_v25 = vld [vmem:[%s2314_s29 + $0x60] sm:$0xff]   ;;  %v1577_v27 = vld [vmem:[%s2304_s19 + $0x68] sm:$0xff]  }
 0x110   : > { %1390 = vmatprep.subr.bf16.mxu0 %v1565_v15  ;;  %v1574_v24 = vld [vmem:[%s2304_s19 + $0x20] sm:$0xff]   ;;  %v1576_v26 = vld [vmem:[%s2314_s29 + $0x20] sm:$0xff]   ;;  %v1578_v28 = vld [vmem:[%s2304_s19 + $0x28] sm:$0xff]  }
 0x111   : > { %1352 = vmatmul.mubr.msk.bf16.vlgmr.msra.gmra.mrb[0].mxu1 %vm693_vm2, %v2330_v8  ;;  %v1579_v29 = vld [vmem:[%s2314_s29 + $0x68] sm:$0xff]   ;;  %v1581_v31 = vld [vmem:[%s2304_s19 + $0x70] sm:$0xff]   ;;  %v1583_v33 = vld [vmem:[%s2314_s29 + $0x70] sm:$0xff]  }
 0x112   : > { %1409 = vmatpush3.bf16.msra.mxu1 %v1560_v10  ;;  %v1580_v30 = vld [vmem:[%s2314_s29 + $0x28] sm:$0xff]   ;;  %v1582_v32 = vld [vmem:[%s2304_s19 + $0x30] sm:$0xff]   ;;  %v1584_v34 = vld [vmem:[%s2314_s29 + $0x30] sm:$0xff]  }
 0x113   : > { %1410 = vmatprep.subr.bf16.mxu1 %v1563_v13  ;;  %1391 = vmatpush3.bf16.msra.mxu0 %v1566_v16  ;;  %v1585_v35 = vld [vmem:[%s2304_s19 + $0x78] sm:$0xff]   ;;  %v1587_v37 = vld [vmem:[%s2314_s29 + $0x78] sm:$0xff]   ;;  %v699_v44 = vld [vmem:[%s2320_s27] sm:$0x3] }
 0x114   : > { %1392 = vmatprep.subr.bf16.mxu0 %v1569_v19  ;;  %v1586_v36 = vld [vmem:[%s2304_s19 + $0x38] sm:$0xff]   ;;  %v1588_v39 = vld [vmem:[%s2314_s29 + $0x38] sm:$0xff]   ;;  %v700_v45 = vunpack.c.l.bf16 %v699_v44  ;;  %v1926_v19 = vmov (!%p1369_p11), 0.0  }
 0x115   : > { %v514_v38 = vld [vmem:[%s2294_s17] sm:$0xff]  ;;  %v797_v9 = vld [vmem:[#allocation3] sm:$0xff]  ;;  %v798_v13 = vld [vmem:[#allocation3 + $0x8] sm:$0xff] }
 0x116   : > { %1411 = vmatpush3.bf16.msra.mxu1 %v1564_v14  ;;  %v1331_v40 = vcombine.high %v514_v38, %v514_v38  ;;  %v1330_v41 = vcombine.low %v514_v38, %v514_v38  ;;  %v705_v48 = vrot.slane %v700_v45, %v704_v46  ;;  %v709_v49 = vrot.slane %v700_v45, %v708_v47  ;;  %v516_v1 = vld [vmem:[#allocation2] sm:$0xff] }
 0x117   : > { %1412 = vmatprep.subr.bf16.mxu1 %v1567_v17  ;;  %1393 = vmatpush3.bf16.msra.mxu0 %v1570_v20  ;;  %v1596_v20 = vld [vmem:[#allocation11 + $0x8] sm:$0xff] (!%p1369_p11)   ;;  %v1376_v45 = vld [vmem:[#allocation15 + $0x2] ss:$0 sm:$0xff] (!%p1369_p11) }
 0x118   : > { %1394 = vmatprep.subr.bf16.mxu0 %v1573_v23  ;;  %684 = vmatprep.mubr.bf16.mxu0 %v1331_v40  ;;  %v715_v50 = vrot.slane %v705_v48, %v704_v46  ;;  %v719_v51 = vrot.slane %v709_v49, %v704_v46 }
 0x11a   : > { %1413 = vmatpush3.bf16.msra.mxu1 %v1568_v18  ;;  %v1595_v18 = vld [vmem:[#allocation11] sm:$0xff] (!%p1369_p11)  }
 0x11b   : > { %1414 = vmatprep.subr.bf16.mxu1 %v1571_v21  ;;  %1395 = vmatpush3.bf16.msra.mxu0 %v1574_v24  ;;  %v1370_v21 = vld [vmem:[#allocation15] ss:$0 sm:$0xff] (!%p1369_p11) }
 0x11c   : > { %1396 = vmatprep.subr.bf16.mxu0 %v1577_v27 }
 0x11e   : > { %1415 = vmatpush3.bf16.msra.mxu1 %v1572_v22 }
 0x11f   : > { %1416 = vmatprep.subr.bf16.mxu1 %v1575_v25  ;;  %1397 = vmatpush3.bf16.msra.mxu0 %v1578_v28  ;;  %v1374_v28 = vld [vmem:[#allocation15 + $0x1] ss:$0 sm:$0xff] (!%p1369_p11) }
 0x120   : > { %1398 = vmatprep.subr.bf16.mxu0 %v1581_v31 }
 0x122   : > { %1417 = vmatpush3.bf16.msra.mxu1 %v1576_v26 }
 0x123   : > { %1418 = vmatprep.subr.bf16.mxu1 %v1579_v29  ;;  %1399 = vmatpush3.bf16.msra.mxu0 %v1582_v32 }
 0x124   : > { %1400 = vmatprep.subr.bf16.mxu0 %v1585_v35 }
 0x126   : > { %1419 = vmatpush3.bf16.msra.mxu1 %v1580_v30 }
 0x127   : > { %1420 = vmatprep.subr.bf16.mxu1 %v1583_v33  ;;  %1401 = vmatpush3.bf16.msra.mxu0 %v1586_v36 }
 0x128   : > { %1433 = vmatprep.subr.bf16.mxu0 (!%p1369_p11), %v1926_v19 }
 0x12a   : > { %1421 = vmatpush3.bf16.msra.mxu1 %v1584_v34  ;;  %685 = vmatmul.mubr.bf16.vlgmr.msra.gmra.mrb[0].mxu0 %v1330_v41 }
 0x12b   : > { %1422 = vmatprep.subr.bf16.mxu1 %v1587_v37  ;;  %1434 = vmatpush3.bf16.msra.mxu0 (!%p1369_p11), %v1595_v18  ;;  %v1375_v37 = vld [vmem:[#allocation15 + $0x3] ss:$0 sm:$0xff] (!%p1369_p11) }
 0x12c   : > { %1437 = vmatprep.mubr.msk.bf16.mxu0 (!%p1369_p11), %vm1927_vm5, %v1926_v19  ;;  %1435 = vmatprep.subr.bf16.mxu0 (!%p1369_p11), %v1926_v19 }
 0x12e   : > { %1423 = vmatpush3.bf16.msra.mxu1 %v1588_v39 }
 0x12f   : > { %1436 = vmatpush3.bf16.msra.mxu0 (!%p1369_p11), %v1596_v20 }
 0x1e4   : > { %v777_v52 = vpop.f32.mrb[0].mxu1 }
 0x1e5   : > { %v778_v53 = vadd.f32 %v777_v52, %v715_v50  ;;  %v779_v54 = vpop.f32.mrb[1].mxu1 }
 0x1e6   : > { %v780_v55 = vadd.f32 %v779_v54, %v719_v51  ;;  %v781_v56 = vpop.f32.mrb[2].mxu1 }
 0x1e7   : > { %1591 = vtanh.f32 %v778_v53  ;;  %v782_v57 = vpop.f32.mrb[3].mxu1 }
 0x1e8   : > { %1593 = vtanh.f32 %v780_v55 }
 0x1f1   : > { %v1592_v58 = vpop.eup %1591 }
 0x1f2   : > { %v1594_v59 = vpop.eup %1593  ;;  %v786_v60 = vpack.c.bf16 %v1592_v58, %v1592_v58 }
 0x1f3   : > { %v787_v61 = vpack.c.bf16 %v1594_v59, %v1594_v59 }
 0x1f4   : > { %v791_v63 = vsel %vm788_vm3, %v786_v60, %v1330_v41 }
 0x1f5   : > { %v795_v62 = vsel %vm788_vm3, %v787_v61, %v1331_v40 }
 0x1f6   : > { %959 = vmatprep.mubr.bf16.mxu1 %v795_v62 }
 0x1f7   : > { %960 = vmatmul.mubr.bf16.vlgmr.msra.gmra.mrb[4].mxu1 %v791_v63 }
 0x1fd   : > { %v1402_v0 = vpop.f32.mrb[0].mxu0 }
 0x1fe   : > { %v1403_v2 = vpop.f32.mrb[1].mxu0 }
 0x1ff   : > { %v1404_v3 = vadd.f32 %v1403_v2, %v1402_v0  ;;  %v1405_v4 = vpop.f32.mrb[2].mxu0 }
 0x200   : > { %v1406_v5 = vpop.f32.mrb[3].mxu0 }
 0x201   : > { %v692_v6 = vadd.f32 %v1404_v3, %v516_v1 }
 0x203   : > { %694 = vst.msk [vmem:[#allocation2] sm:$0xff] %vm693_vm2, %v692_v6 }
 0x20a   : > { %v981_v22 = vld [vmem:[#allocation2] sm:$0xff] (!%p1369_p11) }
 0x20b   : > { %v986_v23 = vadd.f32 (!%p1369_p11), %v1370_v21, %v981_v22 }
 0x20d   : > { %v987_v24 = vpack.c.bf16 (!%p1369_p11), %v986_v23, %v986_v23 }
 0x20f   : > { %v989_v25 = vrot.slane (!%p1369_p11), %v987_v24, 4 }
 0x211   : > { %v991_v26 = vsel (!%p1369_p11), %vm788_vm3, %v2330_v8, %v989_v25 }
 0x212   : > { %1438 = vmatmul.mubr.msk.bf16.vlgmr.msra.gmra.mrb[0].mxu0 (!%p1369_p11), %vm693_vm2, %v991_v26 }
 0x2ca   : > { %v1424_v7 = vpop.f32.mrb[4].mxu1 }
 0x2cb   : > { %v1425_v10 = vpop.f32.mrb[5].mxu1 }
 0x2cc   : > { %v1426_v11 = vadd.f32 %v1425_v10, %v1424_v7  ;;  %v1427_v12 = vpop.f32.mrb[6].mxu1  ;;  %976 = sbr.rel (%p1369_p11) target bundleno = 1150 (0x47e), region = 92 }
 0x2cd   : > { %v1428_v14 = vpop.f32.mrb[7].mxu1 }
 0x2ce   : > { %v968_v15 = vadd.f32 %v1426_v11, %v797_v9  ;;  %v1429_v16 = vadd.f32 %v1428_v14, %v1427_v12 }
 0x2d0   : > { %971 = vst.msk [vmem:[#allocation3] sm:$0xff] %vm970_vm4, %v968_v15  ;;  %v969_v17 = vadd.f32 %v1429_v16, %v798_v13 }
 0x2d2   : > { %972 = vst.msk [vmem:[#allocation3 + $0x8] sm:$0xff] %vm970_vm4, %v969_v17 }
 0x2d7   : > { %v996_v27 = vld [vmem:[#allocation3] sm:$0xff] }
 0x2d9   : > { %v997_v30 = vld [vmem:[#allocation3 + $0x8] sm:$0xff] }
 0x2e5   : > { %v1046_v29 = vpop.f32.mrb[0].mxu0 }
 0x2e6   : > { %v1047_v31 = vadd.f32 %v1046_v29, %v996_v27  ;;  %v1439_v32 = vpop.f32.mrb[1].mxu0 }
 0x2e7   : > { %v1049_v33 = vpop.f32.mrb[2].mxu0 }
 0x2e8   : > { %v1057_v34 = vadd.f32 %v1374_v28, %v1047_v31  ;;  %v1050_v35 = vadd.f32 %v1049_v33, %v997_v30  ;;  %v1440_v36 = vpop.f32.mrb[3].mxu0 }
 0x2ea   : > { %v1058_v38 = vadd.f32 %v1374_v28, %v1050_v35  ;;  %v1059_v39 = vmax.f32 %v1057_v34, 0.0 }
 0x2ec   : > { %v1065_v40 = vmul.f32 %v1375_v37, %v1059_v39  ;;  %v1060_v41 = vmax.f32 %v1058_v38, 0.0 }
 0x2ee   : > { %v1067_v42 = vsel %vm970_vm4, %v1065_v40, 0.0  ;;  %v1066_v8 = vmul.f32 %v1375_v37, %v1060_v41 }
 0x2ef   : > { %1068 = vadd.xlane.f32.xlu0 %v1067_v42 }
 0x2f0   : > { %v1070_v44 = vsel %vm970_vm4, %v1066_v8, 0.0 }
 0x2f3   : > { %1071 = vadd.xlane.f32.xlu0 %v1070_v44 }
 0x37c   : > { %v1069_v46 = vpop.xlane.xlu0 %1068 }
 0x37d   : > { %v1077_v47 = vadd.f32 %v1376_v45, %v1069_v46 }
 0x37f   : > { %v1105_v48 = vsub.f32 0.0, %v1077_v47 }
 0x380   : > { %v1072_v49 = vpop.xlane.xlu0 %1071 }
 0x381   : > { %v1107_v50 = vand.u32 2147483647, %v1105_v48  ;;  %v1078_v51 = vadd.f32 %v1376_v45, %v1072_v49  ;;  %v1106_v0 = vmin.f32 %v1105_v48, 0.0 }
 0x383   : > { %v1108_v52 = vsub.f32 0.0, %v1107_v50  ;;  %v1083_v53 = vand.u32 2147483647, %v1078_v51  ;;  %v1082_v1 = vmin.f32 %v1078_v51, 0.0 }
 0x385   : > { %v1109_v54 = vmul.f32 1.442695, %v1108_v52  ;;  %v1084_v55 = vsub.f32 0.0, %v1083_v53 }
 0x387   : > { %1597 = vpow2.f32 %v1109_v54  ;;  %v1085_v56 = vmul.f32 1.442695, %v1084_v55 }
 0x389   : > { %1599 = vpow2.f32 %v1085_v56 }
 0x391   : > { %v1598_v57 = vpop.eup %1597 }
 0x392   : > { %v1111_v58 = vadd.f32 1.0, %v1598_v57 }
 0x393   : > { %v1600_v59 = vpop.eup %1599 }
 0x394   : > { %1601 = vlog2.f32 %v1111_v58  ;;  %v1087_v60 = vadd.f32 1.0, %v1600_v59 }
 0x396   : > { %1603 = vlog2.f32 %v1087_v60 }
 0x39e   : > { %v1602_v61 = vpop.eup %1601 }
 0x39f   : > { %v1113_v62 = vmul.f32 0.6931472, %v1602_v61 }
 0x3a0   : > { %v1604_v63 = vpop.eup %1603 }
 0x3a1   : > { %v1089_v2 = vmul.f32 0.6931472, %v1604_v63  ;;  %v1114_v4 = vsub.f32 %v1106_v0, %v1113_v62 }
 0x3a3   : > { %v1090_v3 = vsub.f32 %v1082_v1, %v1089_v2  ;;  %v1115_v7 = vsel %vm1081_vm6, %v1114_v4, 0.0 }
 0x3a4   : > { %v1116_v9 = vsel %vm1092_vm7, %v1115_v7, 0.0 }
 0x3a5   : > { %v1091_v5 = vsel %vm1081_vm6, %v1090_v3, 0.0 }
 0x3a6   : > { %v1093_v6 = vsel %vm1092_vm7, %v1091_v5, 0.0 }
 0x3a7   : > { %1094 = vadd.xlane.f32.xlu1 %v1093_v6 }
 0x3ab   : > { %1117 = vadd.xlane.f32.xlu1 %v1116_v9 }
 0x434   : > { %v1095_v10 = vpop.xlane.xlu1 %1094 }
 0x435   : > { %v1096_v11 = vrot.slane %v1095_v10, 4 }
 0x437   : > { %v1097_v12 = vadd.f32 %v1096_v11, %v1095_v10 }
 0x438   : > { %v1118_v13 = vpop.xlane.xlu1 %1117 }
 0x439   : > { %v1098_v14 = vrot.slane %v1097_v12, 2  ;;  %v1119_v15 = vrot.slane %v1118_v13, 4 }
 0x43b   : > { %v1120_v16 = vadd.f32 %v1119_v15, %v1118_v13  ;;  %v1099_v17 = vadd.f32 %v1098_v14, %v1097_v12 }
 0x43d   : > { %v1121_v18 = vrot.slane %v1120_v16, 2  ;;  %v1100_v19 = vrot.slane %v1099_v17, 1 }
 0x43f   : > { %v1122_v20 = vadd.f32 %v1121_v18, %v1120_v16  ;;  %v1101_v21 = vadd.f32 %v1100_v19, %v1099_v17 }
 0x441   : > { %1441 = vpush %v1101_v21  ;;  %v1123_v43 = vrot.slane %v1122_v20, 1 }
 0x443   : > { %v1124_v22 = vadd.f32 %v1123_v43, %v1122_v20 }
 0x445   : > { %1443 = vpush %v1124_v22 }
 0x472   : > { %s1442_s18 = spop %1441 }
 0x473   : > { %s1103_s25 = smul.f32 0.5, %s1442_s18 }
 0x475   : > { %s1104_s11 = smul.f32 -0.5, %s1103_s25 }
 0x476   : > { %s1444_s30 = spop %1443 }
 0x477   : > { %s1126_s13 = smul.f32 0.5, %s1444_s30 }
 0x479   : > { %s1127_s26 = smul.f32 0.5, %s1126_s13 }
 0x47b   : > { %s1128_s14 = ssub.f32 %s1104_s11, %s1127_s26 }
 0x47d   : > { %1130 = sst [smem:[#allocation17]] %s1128_s14 }
 0x47e PF: > { %p1504_p8 = scmp.eq.s32.totalorder %s2072_s15, 3  ;;  %s2478_s23 = sld [smem:[#allocation33_spill]] }
 0x484   : > { %s1839_s10 = scalar_lea.hbm %s2478_s23, 16 }
 0x485   : > { %p1840_p2 = scmp.ne.s32.totalorder %s2478_s23, %s1839_s10  ;;  %p1845_p5 = scmp.lt.u32.totalorder %s1839_s10, %s2478_s23 }
 0x487   : > { %p1841_p6 = pnand %p1840_p2, %p1504_p8 }
 0x489   : > { %p1842_p7 = pneg %p1841_p6 }
 0x48b   : > { %p1847_p9 = pnand %p1845_p5, %p1842_p7 }
 0x48d   : > { %1850 = shalt.err (!%p1847_p9)
}
 0x48e   : > { %s1928_s21 = smov [#allocation17]  }
 0x48f   : > { %1468 = dma.smem_to_hbm (%p1504_p8), %s1928_s21, 16, %s2478_s23, [#allocation6]  }
 0x490   : > { %1892 = dma.done.wait (%p1504_p8), [#allocation6], 16  }
 0x491   : > { %1894 = vsyncadd (%p1504_p8), [#allocation6], 4294967280 }
 0x492   : > { %1144 = sfence }
 0x493 PF: > { %s2479_s30 = sld [smem:[#allocation27_spill]]  ;;  %s2480_s27 = sld [smem:[#allocation25_spill]] }
 0x494   : > { %s2481_s28 = sld [smem:[#allocation26_spill]]  ;;  %s2482_s29 = sld [smem:[#allocation28_spill]] }
 0x499   : > { %p24_p4 = scmp.ge.s32.totalorder %s2479_s30, 6  }
 0x49b   :  { %26 = sbr.rel (!%p24_p4) target bundleno = 13 (0xd), region = 156 }
 0x4a2   :  { %1150 = vsyncpa [#allocation5], 1 }
 0x4a3   :  { %1152 = vsyncpa [#allocation5 + $0x1], 1 }
 0x4a4   :  { %1153 = vsyncpa [#allocation8], 1 }
 0x4a5   :  { %1154 = vsyncpa [#allocation13], 1 }
 0x4a6   :  { %1156 = vsyncpa [#allocation13 + $0x1], 1 }
 0x4a7   :  { %1157 = vsyncpa [#allocation16], 1 }
 0x4a8   :  { %1158 = vsyncpa [#allocation6], 1 }
 0x4a9   :  { %1160 = vsyncpa [#allocation6 + $0x1], 1 }

</bundles_post_ra>
